<compile_context>
chip_gen: v7x
topology: tpu7x:2x2x1
jax: 0.10.0
libtpu: 0.0.40
codegen_flags: <defaults>
</compile_context>

<pallas_src>
import numpy as np
import jax
import jax.numpy as jnp
from jax.experimental import pallas as pl
from jax.experimental.pallas import tpu as pltpu


def _subgraph_kernel(x_ref,       # VMEM (TM, N_sub*Fo)  x[t,s] repeated across the Fo lanes
                     rs_ref,      # VMEM (TM, N_sub*Fo)  adj row-sum[t,s], same lane layout
                     oh_ref,      # VMEM (TM, K)         one-hot accident class per vertex
                     consts_ref,  # VMEM (3, N_sub*Fo)   rows: [A_flat; C_flat; bias_flat]
                     m_ref,       # VMEM (K, N_sub*Fo, Fo)  W_subgraphs folded with final Linear
                     linb_ref,    # VMEM (1, Fo)         final Linear bias
                     out_ref):    # VMEM (TM, Fo)
    x = x_ref[...]                      # (TM, NF)
    rs = rs_ref[...]                    # (TM, NF)
    consts = consts_ref[...]            # (3, NF)
    a_flat = consts[0:1, :]
    c_flat = consts[1:2, :]
    b_flat = consts[2:3, :]

    # res[t, s*Fo+o] = rowsum[t,s] * (x[t,s]*A[s,o] + C[s,o]) + bias[s,o]   (VPU only)
    res = (x * a_flat + c_flat) * rs + b_flat            # (TM, NF)

    oh = oh_ref[...]                    # (TM, K)
    tm = x.shape[0]
    fo = out_ref.shape[-1]
    n_classes = oh.shape[-1]

    # accident-conditioned mixing + fused final Linear: masked accumulation of MXU dots
    acc = jnp.zeros((tm, fo), jnp.float32)
    for k in range(n_classes):          # static unroll, K is small
        acc = acc + oh[:, k:k + 1] * jnp.dot(
            res, m_ref[k], preferred_element_type=jnp.float32)

    out_ref[...] = acc + linb_ref[...]


def sub_graph_parallel_forward(x, accident, W_subgraphs, params, adj_sub, *, tm=256):
    """Pallas implementation of sub_graph_parallel.forward."""
    B, N, N_sub, in_ch = x.shape
    assert in_ch == 1, "linear_in_edge_sub is Linear(1, in_features)"
    Fo = params["bias"].shape[1]
    K = W_subgraphs.shape[0]
    NF = N_sub * Fo
    rows = B * N
    f32 = jnp.float32

    # ---------------- parameter algebra (weight-only folding, no accuracy change) ----
    w_in = params["lin_in_w"].astype(f32)[:, 0]                     # (F,)
    b_in = params["lin_in_b"].astype(f32)                           # (F,)
    weight = params["weight"].astype(f32)                           # (N_sub, F, Fo)
    A = jnp.einsum("f,sfo->so", w_in, weight)                       # (N_sub, Fo)
    C = jnp.einsum("f,sfo->so", b_in, weight)                       # (N_sub, Fo)
    bias = params["bias"].astype(f32)                               # (N_sub, Fo)
    consts = jnp.stack([A.reshape(NF), C.reshape(NF), bias.reshape(NF)], axis=0)  # (3, NF)

    # Fold mixing matrices with the final fused Linear:
    #   M[k, s*Fo+o, j] = sum_m W_subgraphs[k,o,m] * lin_w[j, s*Fo+m]
    lin_w3 = params["lin_w"].astype(f32).reshape(Fo, N_sub, Fo)     # (j, s, m)
    M = jnp.einsum("kom,jsm->ksoj", W_subgraphs.astype(f32), lin_w3).reshape(K, NF, Fo)
    lin_b = params["lin_b"].astype(f32).reshape(1, Fo)              # (1, Fo)

    # ---------------- per-vertex data layout (layout plumbing only) -------------------
    x_flat = x.astype(f32).reshape(rows, N_sub)                     # (rows, N_sub)
    rowsum = jnp.sum(adj_sub.astype(f32), axis=-1)                  # (N, N_sub)
    rs_flat = jnp.broadcast_to(rowsum[None], (B, N, N_sub)).reshape(rows, N_sub)
    # lane-expand: each per-subnode scalar repeated across its Fo feature lanes
    x_exp = jnp.repeat(x_flat, Fo, axis=-1)                         # (rows, NF)
    rs_exp = jnp.repeat(rs_flat, Fo, axis=-1)                       # (rows, NF)

    idx = accident[:, :, 0].astype(jnp.int32).reshape(rows)
    onehot = (idx[:, None] == jnp.arange(K, dtype=jnp.int32)[None, :]).astype(f32)  # (rows, K)

    # ---------------- tile rows; pad to a multiple of TM ------------------------------
    tm = max(8, min(tm, pl.cdiv(rows, 8) * 8))      # TM capped small enough for v7x VMEM
    rows_pad = pl.cdiv(rows, tm) * tm
    pad = rows_pad - rows
    if pad:
        x_exp = jnp.pad(x_exp, ((0, pad), (0, 0)))
        rs_exp = jnp.pad(rs_exp, ((0, pad), (0, 0)))
        onehot = jnp.pad(onehot, ((0, pad), (0, 0)))   # zero mask -> padded rows are inert

    grid_spec = pltpu.PrefetchScalarGridSpec(
        num_scalar_prefetch=0,
        grid=(rows_pad // tm,),
        in_specs=[
            pl.BlockSpec((tm, NF), lambda i: (i, 0)),            # x (lane-expanded)
            pl.BlockSpec((tm, NF), lambda i: (i, 0)),            # adj row-sums
            pl.BlockSpec((tm, K), lambda i: (i, 0)),             # one-hot accident class
            pl.BlockSpec((3, NF), lambda i: (0, 0)),             # [A; C; bias] resident
            pl.BlockSpec((K, NF, Fo), lambda i: (0, 0, 0)),      # folded mixing+linear weights
            pl.BlockSpec((1, Fo), lambda i: (0, 0)),             # final bias
        ],
        out_specs=pl.BlockSpec((tm, Fo), lambda i: (i, 0)),
    )

    out = pl.pallas_call(
        _subgraph_kernel,
        out_shape=jax.ShapeDtypeStruct((rows_pad, Fo), f32),
        grid_spec=grid_spec,
        compiler_params=pltpu.CompilerParams(
            dimension_semantics=("parallel",)),
    )(x_exp, rs_exp, onehot, consts, M, lin_b)

    return out[:rows].reshape(B, N, Fo)


def _reference_forward(x, accident, W_subgraphs, p, adj_sub):
    """Direct JAX transcription of the PyTorch forward (for validation)."""
    B, N, N_sub, _ = x.shape
    x1 = x @ p["lin_in_w"].T + p["lin_in_b"]                        # (B,N,N_sub,F)
    support = jnp.einsum("bijk,jkm->bijm", x1, p["weight"])         # (B,N,N_sub,Fo)
    res = jnp.einsum("ijk,bijm->bijm", adj_sub, support) + p["bias"]
    idx = accident[:, :, 0].astype(jnp.int32)
    W_all = W_subgraphs[idx]                                        # (B,N,Fo,Fo)
    res = jnp.einsum("ijkl,ijlm->ijkm", res, W_all)
    res = res.reshape(B, N, -1)
    return res @ p["lin_w"].T + p["lin_b"]


if __name__ == "__main__":
    B, N, N_sub = 2, 4, 8
    in_features, out_features = 4, 8
    K = 5  # number of candidate W_subgraph matrices

    keys = jax.random.split(jax.random.PRNGKey(0), 10)
    x = jax.random.normal(keys[0], (B, N, N_sub, 1), dtype=jnp.float32)
    accident = jax.random.randint(keys[1], (B, N, 1), 0, K).astype(jnp.float32)
    W_subgraphs = 0.1 * jax.random.normal(keys[2], (K, out_features, out_features), jnp.float32)
    adj_sub = jax.random.uniform(keys[3], (N, N_sub, N_sub), jnp.float32)

    # deterministic synthetic parameters (shapes from __init__)
    params = {
        "lin_in_w": 0.5 * jax.random.normal(keys[4], (in_features, 1), jnp.float32),
        "lin_in_b": 0.1 * jax.random.normal(keys[5], (in_features,), jnp.float32),
        "weight":   0.1 * jax.random.normal(keys[6], (N_sub, in_features, out_features), jnp.float32),
        "bias":     0.1 * jax.random.normal(keys[7], (N_sub, out_features), jnp.float32),
        "lin_w":    0.1 * jax.random.normal(keys[8], (out_features, N_sub * out_features), jnp.float32),
        "lin_b":    0.1 * jax.random.normal(keys[9], (out_features,), jnp.float32),
    }

    out = sub_graph_parallel_forward(x, accident, W_subgraphs, params, adj_sub)
    out = jax.block_until_ready(out)

    ref = _reference_forward(x, accident, W_subgraphs, params, adj_sub)
    np.testing.assert_allclose(np.asarray(out), np.asarray(ref), rtol=1e-4, atol=1e-4)
    print("KERNEL_OK")
</pallas_src>

<mosaic_0001>
module attributes {stable_mosaic.version = 11 : i64} {
  func.func @_subgraph_kernel(%arg0: i32, %arg1: memref<8x64xf32, #tpu.memory_space<vmem>>, %arg2: memref<8x64xf32, #tpu.memory_space<vmem>>, %arg3: memref<8x5xf32, #tpu.memory_space<vmem>>, %arg4: memref<3x64xf32, #tpu.memory_space<vmem>>, %arg5: memref<5x64x8xf32, #tpu.memory_space<vmem>>, %arg6: memref<1x8xf32, #tpu.memory_space<vmem>>, %arg7: memref<8x8xf32, #tpu.memory_space<vmem>>) attributes {dimension_semantics = [#tpu.dimension_semantics<parallel>], iteration_bounds = array<i64: 1>, scalar_prefetch = 0 : i64, scratch_operands = 0 : i64, tpu.core_type = #tpu.core_type<tc>, window_params = [{transform_indices = @transform_0, window_bounds = array<i64: 8, 64>}, {transform_indices = @transform_1, window_bounds = array<i64: 8, 64>}, {transform_indices = @transform_2, window_bounds = array<i64: 8, 5>}, {pipeline_mode = #tpu.pipeline_mode<synchronous>, transform_indices = @transform_3, window_bounds = array<i64: 3, 64>}, {pipeline_mode = #tpu.pipeline_mode<synchronous>, transform_indices = @transform_4, window_bounds = array<i64: 5, 64, 8>}, {pipeline_mode = #tpu.pipeline_mode<synchronous>, transform_indices = @transform_5, window_bounds = array<i64: 1, 8>}, {transform_indices = @transform_6, window_bounds = array<i64: 8, 8>}]} {
    %c0 = arith.constant 0 : index
    %c0_0 = arith.constant 0 : index
    %0 = vector.load %arg1[%c0, %c0_0] : memref<8x64xf32, #tpu.memory_space<vmem>>, vector<8x64xf32>
    %c0_1 = arith.constant 0 : index
    %c0_2 = arith.constant 0 : index
    %1 = vector.load %arg2[%c0_1, %c0_2] : memref<8x64xf32, #tpu.memory_space<vmem>>, vector<8x64xf32>
    %c0_3 = arith.constant 0 : index
    %c0_4 = arith.constant 0 : index
    %2 = vector.load %arg4[%c0_3, %c0_4] : memref<3x64xf32, #tpu.memory_space<vmem>>, vector<3x64xf32>
    %3 = vector.extract_strided_slice %2 {offsets = [0, 0], sizes = [1, 64], strides = [1, 1]} : vector<3x64xf32> to vector<1x64xf32>
    %4 = vector.extract_strided_slice %2 {offsets = [1, 0], sizes = [1, 64], strides = [1, 1]} : vector<3x64xf32> to vector<1x64xf32>
    %5 = vector.extract_strided_slice %2 {offsets = [2, 0], sizes = [1, 64], strides = [1, 1]} : vector<3x64xf32> to vector<1x64xf32>
    %6 = vector.broadcast %3 : vector<1x64xf32> to vector<8x64xf32>
    %7 = arith.mulf %0, %6 : vector<8x64xf32>
    %8 = vector.broadcast %4 : vector<1x64xf32> to vector<8x64xf32>
    %9 = arith.addf %7, %8 : vector<8x64xf32>
    %10 = arith.mulf %9, %1 : vector<8x64xf32>
    %11 = vector.broadcast %5 : vector<1x64xf32> to vector<8x64xf32>
    %12 = arith.addf %10, %11 : vector<8x64xf32>
    %c0_5 = arith.constant 0 : index
    %c0_6 = arith.constant 0 : index
    %13 = vector.load %arg3[%c0_5, %c0_6] : memref<8x5xf32, #tpu.memory_space<vmem>>, vector<8x5xf32>
    %cst = arith.constant 0.000000e+00 : f32
    %14 = vector.broadcast %cst : f32 to vector<8x8xf32>
    %15 = vector.extract_strided_slice %13 {offsets = [0, 0], sizes = [8, 1], strides = [1, 1]} : vector<8x5xf32> to vector<8x1xf32>
    %c0_7 = arith.constant 0 : index
    %c0_8 = arith.constant 0 : index
    %c0_9 = arith.constant 0 : index
    %16 = vector.load %arg5[%c0_7, %c0_8, %c0_9] : memref<5x64x8xf32, #tpu.memory_space<vmem>>, vector<1x64x8xf32>
    %17 = vector.shape_cast %16 : vector<1x64x8xf32> to vector<64x8xf32>
    %cst_10 = arith.constant dense<0.000000e+00> : vector<8x8xf32>
    %18 = tpu.matmul %12, %17, %cst_10 {dimension_numbers = #tpu.dot_dimension_numbers<[1], [0], [0], [1], [0, 0, 1, 1], [], []>} : vector<8x64xf32>, vector<64x8xf32>, vector<8x8xf32> -> vector<8x8xf32>
    %19 = vector.broadcast %15 : vector<8x1xf32> to vector<8x8xf32>
    %20 = arith.mulf %19, %18 : vector<8x8xf32>
    %21 = arith.addf %14, %20 : vector<8x8xf32>
    %22 = vector.extract_strided_slice %13 {offsets = [0, 1], sizes = [8, 1], strides = [1, 1]} : vector<8x5xf32> to vector<8x1xf32>
    %c1 = arith.constant 1 : index
    %c0_11 = arith.constant 0 : index
    %c0_12 = arith.constant 0 : index
    %23 = vector.load %arg5[%c1, %c0_11, %c0_12] : memref<5x64x8xf32, #tpu.memory_space<vmem>>, vector<1x64x8xf32>
    %24 = vector.shape_cast %23 : vector<1x64x8xf32> to vector<64x8xf32>
    %cst_13 = arith.constant dense<0.000000e+00> : vector<8x8xf32>
    %25 = tpu.matmul %12, %24, %cst_13 {dimension_numbers = #tpu.dot_dimension_numbers<[1], [0], [0], [1], [0, 0, 1, 1], [], []>} : vector<8x64xf32>, vector<64x8xf32>, vector<8x8xf32> -> vector<8x8xf32>
    %26 = vector.broadcast %22 : vector<8x1xf32> to vector<8x8xf32>
    %27 = arith.mulf %26, %25 : vector<8x8xf32>
    %28 = arith.addf %21, %27 : vector<8x8xf32>
    %29 = vector.extract_strided_slice %13 {offsets = [0, 2], sizes = [8, 1], strides = [1, 1]} : vector<8x5xf32> to vector<8x1xf32>
    %c2 = arith.constant 2 : index
    %c0_14 = arith.constant 0 : index
    %c0_15 = arith.constant 0 : index
    %30 = vector.load %arg5[%c2, %c0_14, %c0_15] : memref<5x64x8xf32, #tpu.memory_space<vmem>>, vector<1x64x8xf32>
    %31 = vector.shape_cast %30 : vector<1x64x8xf32> to vector<64x8xf32>
    %cst_16 = arith.constant dense<0.000000e+00> : vector<8x8xf32>
    %32 = tpu.matmul %12, %31, %cst_16 {dimension_numbers = #tpu.dot_dimension_numbers<[1], [0], [0], [1], [0, 0, 1, 1], [], []>} : vector<8x64xf32>, vector<64x8xf32>, vector<8x8xf32> -> vector<8x8xf32>
    %33 = vector.broadcast %29 : vector<8x1xf32> to vector<8x8xf32>
    %34 = arith.mulf %33, %32 : vector<8x8xf32>
    %35 = arith.addf %28, %34 : vector<8x8xf32>
    %36 = vector.extract_strided_slice %13 {offsets = [0, 3], sizes = [8, 1], strides = [1, 1]} : vector<8x5xf32> to vector<8x1xf32>
    %c3 = arith.constant 3 : index
    %c0_17 = arith.constant 0 : index
    %c0_18 = arith.constant 0 : index
    %37 = vector.load %arg5[%c3, %c0_17, %c0_18] : memref<5x64x8xf32, #tpu.memory_space<vmem>>, vector<1x64x8xf32>
    %38 = vector.shape_cast %37 : vector<1x64x8xf32> to vector<64x8xf32>
    %cst_19 = arith.constant dense<0.000000e+00> : vector<8x8xf32>
    %39 = tpu.matmul %12, %38, %cst_19 {dimension_numbers = #tpu.dot_dimension_numbers<[1], [0], [0], [1], [0, 0, 1, 1], [], []>} : vector<8x64xf32>, vector<64x8xf32>, vector<8x8xf32> -> vector<8x8xf32>
    %40 = vector.broadcast %36 : vector<8x1xf32> to vector<8x8xf32>
    %41 = arith.mulf %40, %39 : vector<8x8xf32>
    %42 = arith.addf %35, %41 : vector<8x8xf32>
    %43 = vector.extract_strided_slice %13 {offsets = [0, 4], sizes = [8, 1], strides = [1, 1]} : vector<8x5xf32> to vector<8x1xf32>
    %c4 = arith.constant 4 : index
    %c0_20 = arith.constant 0 : index
    %c0_21 = arith.constant 0 : index
    %44 = vector.load %arg5[%c4, %c0_20, %c0_21] : memref<5x64x8xf32, #tpu.memory_space<vmem>>, vector<1x64x8xf32>
    %45 = vector.shape_cast %44 : vector<1x64x8xf32> to vector<64x8xf32>
    %cst_22 = arith.constant dense<0.000000e+00> : vector<8x8xf32>
    %46 = tpu.matmul %12, %45, %cst_22 {dimension_numbers = #tpu.dot_dimension_numbers<[1], [0], [0], [1], [0, 0, 1, 1], [], []>} : vector<8x64xf32>, vector<64x8xf32>, vector<8x8xf32> -> vector<8x8xf32>
    %47 = vector.broadcast %43 : vector<8x1xf32> to vector<8x8xf32>
    %48 = arith.mulf %47, %46 : vector<8x8xf32>
    %49 = arith.addf %42, %48 : vector<8x8xf32>
    %c0_23 = arith.constant 0 : index
    %c0_24 = arith.constant 0 : index
    %50 = vector.load %arg6[%c0_23, %c0_24] : memref<1x8xf32, #tpu.memory_space<vmem>>, vector<1x8xf32>
    %51 = vector.broadcast %50 : vector<1x8xf32> to vector<8x8xf32>
    %52 = arith.addf %49, %51 : vector<8x8xf32>
    %c0_25 = arith.constant 0 : index
    %c0_26 = arith.constant 0 : index
    %53 = vector.load %arg7[%c0_25, %c0_26] : memref<8x8xf32, #tpu.memory_space<vmem>>, vector<8x8xf32>
    tpu.vector_store %arg7[%c0_25, %c0_26], %52 {strides = array<i32>} : memref<8x8xf32, #tpu.memory_space<vmem>>, vector<8x8xf32>,
    return
  }
  func.func @transform_0(%arg0: i32) -> (i32, i32) {
    %c0_i32 = arith.constant 0 : i32
    %c0_i32_0 = arith.constant 0 : i32
    return %arg0, %c0_i32 : i32, i32
  }
  func.func @transform_1(%arg0: i32) -> (i32, i32) {
    %c0_i32 = arith.constant 0 : i32
    %c0_i32_0 = arith.constant 0 : i32
    return %arg0, %c0_i32 : i32, i32
  }
  func.func @transform_2(%arg0: i32) -> (i32, i32) {
    %c0_i32 = arith.constant 0 : i32
    %c0_i32_0 = arith.constant 0 : i32
    return %arg0, %c0_i32 : i32, i32
  }
  func.func @transform_3(%arg0: i32) -> (i32, i32) {
    %c0_i32 = arith.constant 0 : i32
    %c0_i32_0 = arith.constant 0 : i32
    %c0_i32_1 = arith.constant 0 : i32
    return %c0_i32, %c0_i32_0 : i32, i32
  }
  func.func @transform_4(%arg0: i32) -> (i32, i32, i32) {
    %c0_i32 = arith.constant 0 : i32
    %c0_i32_0 = arith.constant 0 : i32
    %c0_i32_1 = arith.constant 0 : i32
    %c0_i32_2 = arith.constant 0 : i32
    return %c0_i32, %c0_i32_0, %c0_i32_1 : i32, i32, i32
  }
  func.func @transform_5(%arg0: i32) -> (i32, i32) {
    %c0_i32 = arith.constant 0 : i32
    %c0_i32_0 = arith.constant 0 : i32
    %c0_i32_1 = arith.constant 0 : i32
    return %c0_i32, %c0_i32_0 : i32, i32
  }
  func.func @transform_6(%arg0: i32) -> (i32, i32) {
    %c0_i32 = arith.constant 0 : i32
    %c0_i32_0 = arith.constant 0 : i32
    return %arg0, %c0_i32 : i32, i32
  }
}

</mosaic_0001>

<bundles_post_ra>
// kernel: tpu_custom_call.1
= control target key start
LH: loop header
LB: loop body
LE: loop exit
PB: predicated region body
PF: predicated region fallthrough
CT: control target
= control target key end

     0   :  { %v27_v3 = vlaneseq  ;;  %v774_v4 = vmov 0.0|0.0   ;;  %vm775_vm0 = vmmov 0   ;;  %v776_v12 = vmov 0.0   ;;  %s1007_s0 = inlined_call_operand.vmem [shape: f32[8,64], index: 0, kind: input, shape index: {}]   ;;  %s1008_s1 = inlined_call_operand.vmem [shape: f32[8,64], index: 1, kind: input, shape index: {}]   ;;  %s1009_s2 = inlined_call_operand.vmem [shape: f32[8,5], index: 2, kind: input, shape index: {}]   ;;  %s1010_s3 = inlined_call_operand.vmem [shape: f32[3,64], index: 3, kind: input, shape index: {}]   ;;  %s1011_s4 = inlined_call_operand.vmem [shape: f32[5,64,8], index: 4, kind: input, shape index: {}]   ;;  %s1012_s5 = inlined_call_operand.vmem [shape: f32[1,8], index: 5, kind: input, shape index: {}]   ;;  %s1013_s6 = inlined_call_operand.hbm [shape: f32[8,8], index: 6, kind: output, shape index: {}]  }
   0x1   :  { %v44_v0 = vld [vmem:[%s1011_s4] sm:$0xff]  ;;  %v45_v1 = vld [vmem:[%s1011_s4 + $0x8] sm:$0xff]  ;;  %675 = vmatprep.subr.bf16.mxu0 %v774_v4  ;;  %687 = vmatprep.subr.bf16.mxu1 %v774_v4  ;;  %v46_v7 = vld [vmem:[%s1011_s4 + $0x10] sm:$0xff]  ;;  %v777_v15 = vmov 0   ;;  %v778_v23 = vmov 2  }
   0x2   :  { %v498_v2 = vld [vmem:[%s1011_s4 + $0x40] sm:$0xff]  ;;  %v676_v5 = vpack.c.bf16 %v45_v1, %v44_v0  ;;  %v499_v6 = vld [vmem:[%s1011_s4 + $0x48] sm:$0xff]  ;;  %v47_v8 = vld [vmem:[%s1011_s4 + $0x18] sm:$0xff]  ;;  %596 = vmatprep.mubr.msk.f32.mxu0 %vm775_vm0, %v776_v12  ;;  %v28_v13 = vshrl.u32 %v27_v3, 7  ;;  %615 = vmatprep.mubr.msk.f32.mxu1 %vm775_vm0, %v776_v12 }
   0x3   :  { %v688_v9 = vpack.c.bf16 %v499_v6, %v498_v2  ;;  %v500_v10 = vld [vmem:[%s1011_s4 + $0x50] sm:$0xff]  ;;  %v501_v11 = vld [vmem:[%s1011_s4 + $0x58] sm:$0xff]  ;;  %v679_v14 = vpack.c.bf16 %v47_v8, %v46_v7  ;;  %744 = vset.pattern.permute.xlu0 %v777_v15  ;;  %v48_v17 = vld [vmem:[%s1011_s4 + $0x20] sm:$0xff]  ;;  %746 = vset.pattern.permute.xlu1 %v778_v23 }
   0x4   :  { %677 = vmatpush3.bf16.msra.mxu0 %v676_v5  ;;  %v691_v16 = vpack.c.bf16 %v501_v11, %v500_v10  ;;  %v49_v18 = vld [vmem:[%s1011_s4 + $0x28] sm:$0xff]  ;;  %v29_v19 = vsub.s32 0, %v28_v13  ;;  %v34_v20 = vsub.s32 1, %v28_v13  ;;  %v502_v21 = vld [vmem:[%s1011_s4 + $0x60] sm:$0xff]  ;;  %v40_v29 = vsub.s32 2, %v28_v13  ;;  %v50_v31 = vld [vmem:[%s1011_s4 + $0x30] sm:$0xff] }
   0x5   :  { %689 = vmatpush3.bf16.msra.mxu1 %v688_v9  ;;  %678 = vmatprep.subr.bf16.mxu0 %v774_v4  ;;  %v503_v22 = vld [vmem:[%s1011_s4 + $0x68] sm:$0xff]  ;;  %v24_v24 = vld [vmem:[%s1007_s0] sm:$0xff]  ;;  %v682_v26 = vpack.c.bf16 %v49_v18, %v48_v17  ;;  %v51_v32 = vld [vmem:[%s1011_s4 + $0x38] sm:$0xff] }
   0x6   :  { %690 = vmatprep.subr.bf16.mxu1 %v774_v4  ;;  %v26_v25 = vld [vmem:[%s1010_s3] sm:$0x7]  ;;  %v694_v30 = vpack.c.bf16 %v503_v22, %v502_v21  ;;  %v504_v33 = vld [vmem:[%s1011_s4 + $0x70] sm:$0xff]  ;;  %v505_v34 = vld [vmem:[%s1011_s4 + $0x78] sm:$0xff]  ;;  %v685_v37 = vpack.c.bf16 %v51_v32, %v50_v31 }
   0x7   :  { %v30_v27 = vrot.slane %v26_v25, %v29_v19  ;;  %v35_v28 = vrot.slane %v26_v25, %v34_v20  ;;  %v25_v36 = vld [vmem:[%s1008_s1] sm:$0xff]  ;;  %v41_v39 = vrot.slane %v26_v25, %v40_v29  ;;  %v697_v40 = vpack.c.bf16 %v505_v34, %v504_v33  ;;  %v508_v42 = vld [vmem:[%s1011_s4 + $0x88] sm:$0xff] }
   0x8   :  { %680 = vmatpush3.bf16.msra.mxu0 %v679_v14  ;;  %v507_v41 = vld [vmem:[%s1011_s4 + $0x80] sm:$0xff]  ;;  %v517_v45 = vld [vmem:[%s1011_s4 + $0xc8] sm:$0xff] }
   0x9   :  { %692 = vmatpush3.bf16.msra.mxu1 %v691_v16  ;;  %681 = vmatprep.subr.bf16.mxu0 %v774_v4  ;;  %v31_v35 = vmul.f32 %v30_v27, %v24_v24  ;;  %v516_v44 = vld [vmem:[%s1011_s4 + $0xc0] sm:$0xff] }
   0xa   :  { %693 = vmatprep.subr.bf16.mxu1 %v774_v4  ;;  %v43_v46 = vld [vmem:[%s1009_s2] sm:$0xff] }
   0xb   :  { %v36_v38 = vadd.f32 %v35_v28, %v31_v35 }
   0xc   :  { %683 = vmatpush3.bf16.msra.mxu0 %v682_v26 }
   0xd   :  { %695 = vmatpush3.bf16.msra.mxu1 %v694_v30  ;;  %684 = vmatprep.subr.bf16.mxu0 %v774_v4  ;;  %v37_v43 = vmul.f32 %v36_v38, %v25_v36 }
   0xe   :  { %696 = vmatprep.subr.bf16.mxu1 %v774_v4 }
   0xf   :  { %11 = vsyncpa [#allocation3], 0  ;;  %v902_v47 = vadd.f32 %v41_v39, %v37_v43  ;;  %vm52_vm1 = vcmask 523264   ;;  %v700_v48 = vpack.c.bf16 %v508_v42, %v507_v41  ;;  %128 = vperm.xlu0 %744, %v43_v46   ;;  %v712_v49 = vpack.c.bf16 %v517_v45, %v516_v44  ;;  %v509_v50 = vld [vmem:[%s1011_s4 + $0x90] sm:$0xff]  ;;  %v510_v51 = vld [vmem:[%s1011_s4 + $0x98] sm:$0xff]  ;;  %298 = vperm.xlu1 %746, %v43_v46   ;;  %s782_s3 = smov [#allocation2]  }
  0x10   :  { %686 = vmatpush3.bf16.msra.mxu0 %v685_v37  ;;  %v518_v52 = vld [vmem:[%s1011_s4 + $0xd0] sm:$0xff]  ;;  %v519_v53 = vld [vmem:[%s1011_s4 + $0xd8] sm:$0xff]  ;;  %v703_v54 = vpack.c.bf16 %v510_v51, %v509_v50  ;;  %v511_v56 = vld [vmem:[%s1011_s4 + $0xa0] sm:$0xff]  ;;  %v779_v60 = vmov 1   ;;  %v780_v3 = vmov 3   ;;  %v781_v6 = vmov 4  }
  0x11   :  { %698 = vmatpush3.bf16.msra.mxu1 %v697_v40  ;;  %699 = vmatprep.subr.bf16.mxu0 %v774_v4  ;;  %v715_v55 = vpack.c.bf16 %v519_v53, %v518_v52  ;;  %v512_v57 = vld [vmem:[%s1011_s4 + $0xa8] sm:$0xff]  ;;  %v520_v58 = vld [vmem:[%s1011_s4 + $0xe0] sm:$0xff]  ;;  %v513_v63 = vld [vmem:[%s1011_s4 + $0xb0] sm:$0xff]  ;;  %s489_s29 = sshll.u32 %s782_s3, 4  ;;  %vm481_vm2 = vcmask 64512   ;;  %s490_s29 = int_to_ptr.vmem [resolvable:$true] %s489_s29 }
  0x12   :  { %711 = vmatprep.subr.bf16.mxu1 %v774_v4  ;;  %v521_v59 = vld [vmem:[%s1011_s4 + $0xe8] sm:$0xff]  ;;  %v706_v61 = vpack.c.bf16 %v512_v57, %v511_v56  ;;  %v514_v0 = vld [vmem:[%s1011_s4 + $0xb8] sm:$0xff]  ;;  %v522_v1 = vld [vmem:[%s1011_s4 + $0xf0] sm:$0xff]  ;;  %s750_s30 = scalar_lea.vmem %s490_s29, 128  ;;  %p755_p1 = scmp.lt.s32.totalorder %s490_s29, %s490_s29 }
  0x13   :  { %597 = vmatmul.mubr.msk.f32.vlgmr.msra.gmra.mrb[0].mxu0 %vm52_vm1, %v902_v47  ;;  %745 = vset.pattern.permute.xlu0 %v779_v60  ;;  %v718_v62 = vpack.c.bf16 %v521_v59, %v520_v58  ;;  %v523_v2 = vld [vmem:[%s1011_s4 + $0xf8] sm:$0xff]  ;;  %v709_v5 = vpack.c.bf16 %v514_v0, %v513_v63  ;;  %v525_v8 = vld [vmem:[%s1011_s4 + $0x100] sm:$0xff]  ;;  %v526_v9 = vld [vmem:[%s1011_s4 + $0x108] sm:$0xff]  ;;  %p751_p0 = scmp.ne.s32.totalorder %s490_s29, %s750_s30  ;;  %p756_p2 = scmp.lt.s32.totalorder %s750_s30, %s750_s30 }
  0x14   :  { %616 = vmatmul.mubr.msk.f32.vlgmr.msra.gmra.mrb[0].mxu1 %vm52_vm1, %v902_v47  ;;  %701 = vmatpush3.bf16.msra.mxu0 %v700_v48  ;;  %v721_v7 = vpack.c.bf16 %v523_v2, %v522_v1  ;;  %v724_v10 = vpack.c.bf16 %v526_v9, %v525_v8  ;;  %v527_v11 = vld [vmem:[%s1011_s4 + $0x110] sm:$0xff]  ;;  %v528_v13 = vld [vmem:[%s1011_s4 + $0x118] sm:$0xff]  ;;  %v529_v15 = vld [vmem:[%s1011_s4 + $0x120] sm:$0xff] }
  0x15   :  { %713 = vmatpush3.bf16.msra.mxu1 %v712_v49  ;;  %702 = vmatprep.subr.bf16.mxu0 %v774_v4  ;;  %v727_v14 = vpack.c.bf16 %v528_v13, %v527_v11  ;;  %v530_v16 = vld [vmem:[%s1011_s4 + $0x128] sm:$0xff]  ;;  %v531_v18 = vld [vmem:[%s1011_s4 + $0x130] sm:$0xff]  ;;  %v532_v19 = vld [vmem:[%s1011_s4 + $0x138] sm:$0xff]  ;;  %p757_p3 = por %p756_p2, %p755_p1 }
  0x16   :  { %714 = vmatprep.subr.bf16.mxu1 %v774_v4  ;;  %634 = vmatprep.mubr.msk.f32.mxu0 %vm775_vm0, %v776_v12  ;;  %v730_v17 = vpack.c.bf16 %v530_v16, %v529_v15  ;;  %v733_v20 = vpack.c.bf16 %v532_v19, %v531_v18  ;;  %v534_v42 = vld [vmem:[%s1012_s5] ss:$0 sm:$0xff] }
  0x17   :  { %653 = vmatprep.mubr.msk.f32.mxu1 %vm775_vm0, %v776_v12  ;;  %213 = vperm.xlu0 %745, %v43_v46   ;;  %p758_p4 = pnand %p757_p3, %p751_p0 }
  0x18   :  { %704 = vmatpush3.bf16.msra.mxu0 %v703_v54  ;;  %747 = vset.pattern.permute.xlu1 %v780_v3 }
  0x19   :  { %716 = vmatpush3.bf16.msra.mxu1 %v715_v55  ;;  %705 = vmatprep.subr.bf16.mxu0 %v774_v4 }
  0x1a   :  { %717 = vmatprep.subr.bf16.mxu1 %v774_v4  ;;  %383 = vperm.xlu1 %747, %v43_v46  }
  0x1b   :  { %749 = vset.pattern.permute.xlu0 %v781_v6 }
  0x1c   :  { %707 = vmatpush3.bf16.msra.mxu0 %v706_v61 }
  0x1d   :  { %719 = vmatpush3.bf16.msra.mxu1 %v718_v62  ;;  %708 = vmatprep.subr.bf16.mxu0 %v774_v4 }
  0x1e   :  { %720 = vmatprep.subr.bf16.mxu1 %v774_v4  ;;  %748 = vset.pattern.permute.xlu1 %v781_v6 }
  0x1f   :  { %468 = vperm.xlu1 %748, %v43_v46  }
  0x20   :  { %710 = vmatpush3.bf16.msra.mxu0 %v709_v5 }
  0x21   :  { %722 = vmatpush3.bf16.msra.mxu1 %v721_v7  ;;  %723 = vmatprep.subr.bf16.mxu0 %v774_v4 }
  0x23   :  { %635 = vmatmul.mubr.msk.f32.vlgmr.msra.gmra.mrb[2].mxu0 %vm52_vm1, %v902_v47 }
  0x24   :  { %725 = vmatpush3.bf16.msra.mxu0 %v724_v10  ;;  %654 = vmatmul.mubr.msk.f32.vlgmr.msra.gmra.mrb[2].mxu1 %vm52_vm1, %v902_v47 }
  0x25   :  { %726 = vmatprep.subr.bf16.mxu0 %v774_v4  ;;  %672 = vmatprep.mubr.msk.f32.mxu0 %vm775_vm0, %v776_v12 }
  0x28   :  { %728 = vmatpush3.bf16.msra.mxu0 %v727_v14 }
  0x29   :  { %729 = vmatprep.subr.bf16.mxu0 %v774_v4 }
  0x2c   :  { %731 = vmatpush3.bf16.msra.mxu0 %v730_v17 }
  0x2d   :  { %732 = vmatprep.subr.bf16.mxu0 %v774_v4 }
  0x30   :  { %734 = vmatpush3.bf16.msra.mxu0 %v733_v20 }
  0x33   :  { %673 = vmatmul.mubr.msk.f32.vlgmr.msra.gmra.mrb[4].mxu0 %vm52_vm1, %v902_v47 }
  0x8e   :  { %v129_v12 = vpop.permute.xlu0 %128  ;;  %v299_v29 = vpop.permute.xlu1 %298 }
  0x96   :  { %v214_v21 = vpop.permute.xlu0 %213 }
  0x99   :  { %v384_v30 = vpop.permute.xlu1 %383 }
  0x9e   :  { %v469_v38 = vpop.permute.xlu1 %468 }
  0xe6   :  { %v122_v22 = vpop.f32.mrb[0].mxu0 }
  0xe7   :  { %v131_v23 = vmul.f32 %v129_v12, %v122_v22  ;;  %v598_v24 = vpop.f32.mrb[1].mxu0  ;;  %v208_v25 = vpop.f32.mrb[0].mxu1 }
  0xe8   :  { %v216_v26 = vmul.f32 %v214_v21, %v208_v25  ;;  %v617_v27 = vpop.f32.mrb[1].mxu1 }
  0xea   :  { %v217_v28 = vadd.f32 %v216_v26, %v131_v23 }
  0xf6   :  { %v293_v31 = vpop.f32.mrb[2].mxu0 }
  0xf7   :  { %v301_v32 = vmul.f32 %v299_v29, %v293_v31  ;;  %v636_v33 = vpop.f32.mrb[3].mxu0  ;;  %v378_v34 = vpop.f32.mrb[2].mxu1 }
  0xf8   :  { %v386_v4 = vmul.f32 %v384_v30, %v378_v34  ;;  %v655_v35 = vpop.f32.mrb[3].mxu1 }
  0xf9   :  { %v302_v36 = vadd.f32 %v301_v32, %v217_v28 }
  0xfb   :  { %v387_v37 = vadd.f32 %v386_v4, %v302_v36 }
 0x106   :  { %v463_v39 = vpop.f32.mrb[4].mxu0 }
 0x107   :  { %v471_v40 = vmul.f32 %v469_v38, %v463_v39  ;;  %v674_v41 = vpop.f32.mrb[5].mxu0 }
 0x109   :  { %v472_v43 = vadd.f32 %v471_v40, %v387_v37 }
 0x10b   :  { %v480_v44 = vadd.f32 %v534_v42, %v472_v43 }
 0x10d   :  { %482 = vst.msk [vmem:[#allocation2] sm:$0xff] %vm481_vm2, %v480_v44 }
 0x10e   :  { %761 = shalt.err (!%p758_p4)
}
 0x10f   :  { %s762_s9 = scalar_lea.hbm %s1013_s6, 128 }
 0x110   :  { %p763_p5 = scmp.ne.s32.totalorder %s1013_s6, %s762_s9  ;;  %p766_p6 = scmp.lt.u32.totalorder %s762_s9, %s1013_s6 }
 0x112   :  { %p768_p7 = pnand %p766_p6, %p763_p5 }
 0x114   :  { %771 = shalt.err (!%p768_p7)
}
 0x115   :  { %492 = dma.vmem_to_hbm [thread:$0]  %s490_s29, 128, %s1013_s6, [#allocation3]  }
 0x116   :  { %772 = dma.done.wait [#allocation3], 128  }
 0x117   :  { %773 = vsyncadd [#allocation3], 4294967168 }
 0x118   :  { %496 = vsyncpa [#allocation3], 1 }

</bundles_post_ra>
